<compile_context>
chip_gen: v5e
topology: v5e:2x2
jax: 0.10.0
libtpu: 0.0.40
codegen_flags: <defaults>
</compile_context>

<pallas_src>
import math

import jax
import jax.numpy as jnp
from jax.experimental import pallas as pl
from jax.experimental.pallas import tpu as pltpu

LANE = 128                        # vreg lane width
SUBLANE_F32 = 8                   # f32 sublane granularity (the (8,128) rule)
TILE_BYTES_MAX = 8 * 1024 * 1024  # 8 MiB per tile -> 4 bufs = 32 MiB VMEM
SMALL_LIMIT_BYTES = 2 * 1024 * 1024  # below this: single block, no splitting
MIN_GRID_STEPS = 8                # >= 4 pipelined tiles per TensorCore on v7x
VMEM_LIMIT_BYTES = 48 * 1024 * 1024


def _round_up(x, m):
    return ((x + m - 1) // m) * m


# ---------------------------------------------------------------------------
# Zero-copy identity: output HBM buffer aliases the input, body moves nothing.
# ---------------------------------------------------------------------------
def _noop_kernel(x_hbm_ref, o_hbm_ref):
    # Output buffer is aliased to the input (input_output_aliases={0: 0});
    # the identity requires no data movement at all.
    pass


def _identity_alias(x):
    return pl.pallas_call(
        _noop_kernel,
        out_shape=jax.ShapeDtypeStruct(x.shape, x.dtype),
        in_specs=[pl.BlockSpec(memory_space=pl.ANY)],
        out_specs=pl.BlockSpec(memory_space=pl.ANY),
        input_output_aliases={0: 0},
    )(x)


# ---------------------------------------------------------------------------
# Explicit streaming copy (distinct output buffer), lane-dense where possible.
# ---------------------------------------------------------------------------
def _copy_kernel(x_ref, o_ref):
    o_ref[...] = x_ref[...]


def _identity_copy(x):
    orig_shape = x.shape
    dtype = x.dtype
    itemsize = jnp.dtype(dtype).itemsize
    # dtype-aware sublane granularity: 8 (f32) / 16 (bf16) / 32 (int8, fp8)
    sub = max(SUBLANE_F32, SUBLANE_F32 * (4 // itemsize))

    n = math.prod(orig_shape) if orig_shape else 1
    if n == 0:
        return x

    # 2-D view with NO host-side padding:
    #   * element count divisible by 128 -> lane-dense (n/128, 128) view
    #   * otherwise keep the natural trailing dim (full-dim blocks are legal)
    if n % LANE == 0:
        rows, cols = n // LANE, LANE
    elif len(orig_shape) >= 2:
        cols = orig_shape[-1]
        rows = n // cols
    else:
        rows, cols = 1, n
    x2d = x.reshape(rows, cols)

    total_bytes = n * itemsize
    row_bytes = cols * itemsize

    if total_bytes <= SMALL_LIMIT_BYTES:
        # Tiny tensor: one grid step, one block covering everything.  Block
        # dims equal the full array dims, so no sublane/lane rounding needed.
        rows_per_tile = rows
        grid = (1,)
    else:
        # Large tensor: cap tiles at ~8 MiB and target >= MIN_GRID_STEPS
        # pipelined tiles so both v7x TensorCores stay busy and the DMA is
        # double-buffered.  rows_per_tile is a multiple of the dtype's sublane
        # granularity; a partial last block is masked by Pallas in-kernel.
        cap_rows = max(sub, (TILE_BYTES_MAX // row_bytes) // sub * sub)
        want_rows = _round_up(pl.cdiv(rows, MIN_GRID_STEPS), sub)
        rows_per_tile = max(sub, min(cap_rows, want_rows))
        grid = (pl.cdiv(rows, rows_per_tile),)

    out2d = pl.pallas_call(
        _copy_kernel,
        out_shape=jax.ShapeDtypeStruct((rows, cols), dtype),
        grid=grid,
        in_specs=[pl.BlockSpec((rows_per_tile, cols), lambda i: (i, 0))],
        out_specs=pl.BlockSpec((rows_per_tile, cols), lambda i: (i, 0)),
        compiler_params=pltpu.CompilerParams(
            dimension_semantics=("parallel",),
            vmem_limit_bytes=VMEM_LIMIT_BYTES,
        ),
    )(x2d)

    return out2d.reshape(orig_shape)


def dummy_layer_forward(x, *, copy=False):
    """Pallas implementation of DummyLayer.forward (identity).

    copy=False (default): zero-data-movement aliased output.
    copy=True: distinct output buffer via a lane-dense streaming copy.
    """
    if not copy:
        return _identity_alias(x)
    return _identity_copy(x)


if __name__ == "__main__":
    # Small shape consistent with a DyHead feature map: batch=2, C=4, 16x16.
    x = jax.random.normal(jax.random.PRNGKey(0), (2, 4, 16, 16), jnp.float32)

    # Default zero-copy (aliased) path.
    y = jax.block_until_ready(dummy_layer_forward(x))
    assert y.shape == x.shape and y.dtype == x.dtype
    assert bool(jnp.array_equal(y, x))

    # Explicit-copy path, f32 lane-dense (2048 elems -> (16, 128) view).
    y = jax.block_until_ready(dummy_layer_forward(x, copy=True))
    assert y.shape == x.shape and y.dtype == x.dtype
    assert bool(jnp.array_equal(y, x))

    # bf16 input exercises the dtype-aware sublane rounding.
    xb = x.astype(jnp.bfloat16)
    yb = jax.block_until_ready(dummy_layer_forward(xb, copy=True))
    assert yb.dtype == xb.dtype and bool(jnp.array_equal(yb, xb))

    # Ragged element count (231, not a multiple of 128): no host-side pad,
    # full-dim blocks handle it inside the kernel.
    xr = jax.random.normal(jax.random.PRNGKey(0), (3, 7, 11), jnp.float32)
    yr = jax.block_until_ready(dummy_layer_forward(xr, copy=True))
    assert yr.shape == xr.shape and bool(jnp.array_equal(yr, xr))

    print("KERNEL_OK")
</pallas_src>

<mosaic_0001>
module attributes {stable_mosaic.version = 11 : i64} {
  func.func @_noop_kernel(%arg0: memref<2x4x16x16xf32, #tpu.memory_space<any>>, %arg1: memref<2x4x16x16xf32, #tpu.memory_space<any>>) attributes {dimension_semantics = [], scalar_prefetch = 0 : i64, scratch_operands = 0 : i64, tpu.core_type = #tpu.core_type<tc>} {
    return
  }
}

</mosaic_0001>

<bundles_post_ra>
// kernel: tpu_custom_call.1
= control target key start
LH: loop header
LB: loop body
LE: loop exit
PB: predicated region body
PF: predicated region fallthrough
CT: control target
= control target key end

     0   :  { %s16_s0 = inlined_call_operand.hbm [shape: f32[2,4,16,16], index: 0, kind: input, shape index: {}, may-alias: {0,1}]   ;;  %s17_s1 = inlined_call_operand.hbm [shape: f32[2,4,16,16], index: 1, kind: output, shape index: {}, may-alias: {0,1}]  }

</bundles_post_ra>
